<compile_context>
chip_gen: v7x
topology: tpu7x:2x2x1
jax: 0.10.0
libtpu: 0.0.40
codegen_flags: <defaults>
</compile_context>

<pallas_src>
import math

import jax
import jax.numpy as jnp
from jax.experimental import pallas as pl
from jax.experimental.pallas import tpu as pltpu

OBS_C, OBS_F = 4, 107
IN_DIM = OBS_C * OBS_F            # 428
IN_PAD = 512                      # 428 padded to a lane-friendly 512
H1, H2, H3 = 256, 128, 64
H3_PAD = 128                      # 64 padded to 128
ACT_DIM = 6
OUT_PAD = 128                     # head width padded to one full set of lanes

# variance transform folded: s = (0.1-1e-8)*(v+1)/2 + 1e-8 = VAR_A*v + VAR_C
VAR_A = (0.1 - 1e-8) / 2.0
VAR_C = VAR_A + 1e-8
LOG2PI = math.log(2.0 * math.pi)


# --------------------------------------------------------------------------
# Kernels
# --------------------------------------------------------------------------
def _trunk_bf16(obs_ref, w1, b1, w2, b2, w3, b3):
    """Shared tanh-MLP trunk: (TM, 512) -> (TM, 128), returned as bf16."""
    x = obs_ref[...].astype(jnp.bfloat16)
    h = jnp.tanh(jnp.dot(x, w1[...], preferred_element_type=jnp.float32) + b1[...])
    h = jnp.tanh(jnp.dot(h.astype(jnp.bfloat16), w2[...],
                         preferred_element_type=jnp.float32) + b2[...])
    h = jnp.tanh(jnp.dot(h.astype(jnp.bfloat16), w3[...],
                         preferred_element_type=jnp.float32) + b3[...])
    return h.astype(jnp.bfloat16)


def _sample_kernel(obs_ref, w1, b1, w2, b2, w3, b3,
                   w4m, b4m, w4v, b4v, eps_ref, out_ref):
    h3 = _trunk_bf16(obs_ref, w1, b1, w2, b2, w3, b3)

    # Mean / variance heads.  Real outputs live in lanes 0..5; padded lanes
    # give tanh(0 + 0) = 0, so everything stays lane-aligned with eps.
    mean = jnp.tanh(jnp.dot(h3, w4m[...], preferred_element_type=jnp.float32)
                    + b4m[...])
    vraw = jnp.tanh(jnp.dot(h3, w4v[...], preferred_element_type=jnp.float32)
                    + b4v[...])

    # s == log(var);  std = sqrt(exp(s)) = exp(0.5*s)
    s = VAR_A * vraw + VAR_C
    std = jnp.exp(0.5 * s)

    eps = eps_ref[...]                       # zero beyond lane 5
    actions = mean + std * eps               # lanes >= 6 stay exactly 0

    # log N(a | mu, diag(var)):  diff^2/var == eps^2,  log var == s  (exact).
    lane = jax.lax.broadcasted_iota(jnp.int32, actions.shape, 1)
    s_real = jnp.where(lane < ACT_DIM, s, 0.0)
    logp = -0.5 * (jnp.sum(eps * eps + s_real, axis=-1, keepdims=True)
                   + ACT_DIM * LOG2PI)

    # Single lane-dense slab: actions in lanes 0..5, logp in lane 6, rest 0.
    out_ref[...] = jnp.where(lane == ACT_DIM, logp, actions)


def _det_kernel(obs_ref, w1, b1, w2, b2, w3, b3, w4m, b4m, out_ref):
    """Deterministic path: stop at the means (no sample / log-prob tail)."""
    h3 = _trunk_bf16(obs_ref, w1, b1, w2, b2, w3, b3)
    mean = jnp.tanh(jnp.dot(h3, w4m[...], preferred_element_type=jnp.float32)
                    + b4m[...])
    out_ref[...] = mean


# --------------------------------------------------------------------------
# Wrapper
# --------------------------------------------------------------------------
def _round_up(x, m):
    return (x + m - 1) // m * m


def testpolicy_forward(obs, kparams, eps=None, deterministic=False):
    """obs: (B, 4, 107) float32.  Returns (actions, action_logprobs)."""
    B = obs.shape[0]
    tm = 256 if B >= 256 else _round_up(B, 8)
    b_pad = _round_up(B, tm)
    grid = (b_pad // tm,)

    obs_flat = obs.reshape(B, IN_DIM).astype(jnp.float32)   # nn.Flatten(start_dim=1)
    obs_p = jnp.zeros((b_pad, IN_PAD), jnp.float32).at[:B, :IN_DIM].set(obs_flat)

    def row_spec(width):
        return pl.BlockSpec((tm, width), lambda i: (i, 0))

    def const_spec(shape):
        nd = len(shape)
        return pl.BlockSpec(shape, lambda i, _nd=nd: (0,) * _nd)

    (w1, b1, w2, b2, w3, b3, w4m, b4m, w4v, b4v) = kparams
    trunk_inputs = (w1, b1, w2, b2, w3, b3, w4m, b4m)
    trunk_specs = [const_spec(x.shape) for x in trunk_inputs]

    cparams = pltpu.CompilerParams(dimension_semantics=("parallel",))

    if deterministic:
        slab = pl.pallas_call(
            _det_kernel,
            out_shape=jax.ShapeDtypeStruct((b_pad, OUT_PAD), jnp.float32),
            grid=grid,
            in_specs=[row_spec(IN_PAD)] + trunk_specs,
            out_specs=row_spec(OUT_PAD),
            compiler_params=cparams,
        )(obs_p, *trunk_inputs)
        # torch path returns actions = means, logprobs = None
        return slab[:B, :ACT_DIM], None

    eps_p = jnp.zeros((b_pad, OUT_PAD), jnp.float32).at[:B, :ACT_DIM].set(
        eps.astype(jnp.float32))
    slab = pl.pallas_call(
        _sample_kernel,
        out_shape=jax.ShapeDtypeStruct((b_pad, OUT_PAD), jnp.float32),
        grid=grid,
        in_specs=([row_spec(IN_PAD)] + trunk_specs
                  + [const_spec(w4v.shape), const_spec(b4v.shape),
                     row_spec(OUT_PAD)]),
        out_specs=row_spec(OUT_PAD),
        compiler_params=cparams,
    )(obs_p, *trunk_inputs, w4v, b4v, eps_p)

    actions = slab[:B, :ACT_DIM]
    logp = slab[:B, ACT_DIM]
    return actions, logp


# --------------------------------------------------------------------------
# Parameters
# --------------------------------------------------------------------------
def init_params(key):
    """PyTorch-style Linear init; f32 weights stored as (in, out), biases (out,)."""
    dims = [(IN_DIM, H1), (H1, H2), (H2, H3), (H3, 2 * ACT_DIM)]
    params = []
    for fan_in, fan_out in dims:
        key, kw, kb = jax.random.split(key, 3)
        bound = 1.0 / math.sqrt(fan_in)
        w = jax.random.uniform(kw, (fan_in, fan_out), jnp.float32, -bound, bound)
        b = jax.random.uniform(kb, (fan_out,), jnp.float32, -bound, bound)
        params.append((w, b))
    return params


def prepare_kernel_params(params):
    """Pad to lane-dense shapes, split the last layer into mean/var heads, and
    cast matmul weights to bf16 (biases stay f32, as (1, width) rows)."""
    (w1, b1), (w2, b2), (w3, b3), (w4, b4) = params

    w1p = jnp.zeros((IN_PAD, H1), jnp.float32).at[:IN_DIM].set(w1)
    w3p = jnp.zeros((H2, H3_PAD), jnp.float32).at[:, :H3].set(w3)
    b3p = jnp.zeros((1, H3_PAD), jnp.float32).at[0, :H3].set(b3)

    w4m = jnp.zeros((H3_PAD, OUT_PAD), jnp.float32).at[:H3, :ACT_DIM].set(
        w4[:, :ACT_DIM])
    b4m = jnp.zeros((1, OUT_PAD), jnp.float32).at[0, :ACT_DIM].set(b4[:ACT_DIM])
    w4v = jnp.zeros((H3_PAD, OUT_PAD), jnp.float32).at[:H3, :ACT_DIM].set(
        w4[:, ACT_DIM:])
    b4v = jnp.zeros((1, OUT_PAD), jnp.float32).at[0, :ACT_DIM].set(b4[ACT_DIM:])

    bf = jnp.bfloat16
    return (w1p.astype(bf), b1.reshape(1, H1),
            w2.astype(bf), b2.reshape(1, H2),
            w3p.astype(bf), b3p,
            w4m.astype(bf), b4m,
            w4v.astype(bf), b4v)


def reference_forward(obs, params, eps, deterministic=False):
    """Pure-JAX f32 reference following the original PyTorch math."""
    (w1, b1), (w2, b2), (w3, b3), (w4, b4) = params
    x = obs.reshape(obs.shape[0], IN_DIM)
    h = jnp.tanh(x @ w1 + b1)
    h = jnp.tanh(h @ w2 + b2)
    h = jnp.tanh(h @ w3 + b3)
    out = jnp.tanh(h @ w4 + b4)
    means, vraw = out[:, :ACT_DIM], out[:, ACT_DIM:]
    var = jnp.exp((0.1 - 1e-8) * (vraw + 1.0) / 2.0 + 1e-8)
    if deterministic:
        return means, None
    actions = means + jnp.sqrt(var) * eps
    diff = actions - means
    logp = -0.5 * jnp.sum(diff * diff / var + jnp.log(var) + LOG2PI, axis=1)
    return actions, logp


# --------------------------------------------------------------------------
if __name__ == "__main__":
    key = jax.random.PRNGKey(0)
    k_params, k_obs, k_eps = jax.random.split(key, 3)

    params = init_params(k_params)
    kparams = prepare_kernel_params(params)

    B = 8
    obs = jax.random.normal(k_obs, (B, OBS_C, OBS_F), jnp.float32)
    # TODO(synk): torch dist.rsample()/.sample() RNG draw stays outside the
    # kernel; eps is supplied as an input (could move to pltpu.prng_* if
    # bit-exact reproducibility vs jax.random is not required).
    eps = jax.random.normal(k_eps, (B, ACT_DIM), jnp.float32)

    # stochastic (reparametrize=True) path
    actions, logprobs = testpolicy_forward(obs, kparams, eps, deterministic=False)
    jax.block_until_ready((actions, logprobs))
    assert actions.shape == (B, ACT_DIM) and logprobs.shape == (B,)

    ref_a, ref_lp = reference_forward(obs, params, eps, deterministic=False)
    assert bool(jnp.allclose(actions, ref_a, atol=5e-2, rtol=0)), "actions mismatch"
    assert bool(jnp.allclose(logprobs, ref_lp, atol=5e-2, rtol=0)), "logprob mismatch"

    # deterministic path: actions == tanh-MLP means, logprobs is None
    det_actions, det_logp = testpolicy_forward(obs, kparams, deterministic=True)
    jax.block_until_ready(det_actions)
    ref_means, _ = reference_forward(obs, params, eps, deterministic=True)
    assert det_actions.shape == (B, ACT_DIM) and det_logp is None
    assert bool(jnp.allclose(det_actions, ref_means, atol=5e-2, rtol=0)), \
        "deterministic actions mismatch"

    print("KERNEL_OK")
</pallas_src>

<mosaic_0001>
module attributes {stable_mosaic.version = 11 : i64} {
  func.func @_sample_kernel(%arg0: i32, %arg1: memref<8x512xf32, #tpu.memory_space<vmem>>, %arg2: memref<512x256xbf16, #tpu.memory_space<vmem>>, %arg3: memref<1x256xf32, #tpu.memory_space<vmem>>, %arg4: memref<256x128xbf16, #tpu.memory_space<vmem>>, %arg5: memref<1x128xf32, #tpu.memory_space<vmem>>, %arg6: memref<128x128xbf16, #tpu.memory_space<vmem>>, %arg7: memref<1x128xf32, #tpu.memory_space<vmem>>, %arg8: memref<128x128xbf16, #tpu.memory_space<vmem>>, %arg9: memref<1x128xf32, #tpu.memory_space<vmem>>, %arg10: memref<128x128xbf16, #tpu.memory_space<vmem>>, %arg11: memref<1x128xf32, #tpu.memory_space<vmem>>, %arg12: memref<8x128xf32, #tpu.memory_space<vmem>>, %arg13: memref<8x128xf32, #tpu.memory_space<vmem>>) attributes {dimension_semantics = [#tpu.dimension_semantics<parallel>], iteration_bounds = array<i64: 1>, scalar_prefetch = 0 : i64, scratch_operands = 0 : i64, tpu.core_type = #tpu.core_type<tc>, window_params = [{transform_indices = @transform_0, window_bounds = array<i64: 8, 512>}, {pipeline_mode = #tpu.pipeline_mode<synchronous>, transform_indices = @transform_1, window_bounds = array<i64: 512, 256>}, {pipeline_mode = #tpu.pipeline_mode<synchronous>, transform_indices = @transform_2, window_bounds = array<i64: 1, 256>}, {pipeline_mode = #tpu.pipeline_mode<synchronous>, transform_indices = @transform_3, window_bounds = array<i64: 256, 128>}, {pipeline_mode = #tpu.pipeline_mode<synchronous>, transform_indices = @transform_4, window_bounds = array<i64: 1, 128>}, {pipeline_mode = #tpu.pipeline_mode<synchronous>, transform_indices = @transform_5, window_bounds = array<i64: 128, 128>}, {pipeline_mode = #tpu.pipeline_mode<synchronous>, transform_indices = @transform_6, window_bounds = array<i64: 1, 128>}, {pipeline_mode = #tpu.pipeline_mode<synchronous>, transform_indices = @transform_7, window_bounds = array<i64: 128, 128>}, {pipeline_mode = #tpu.pipeline_mode<synchronous>, transform_indices = @transform_8, window_bounds = array<i64: 1, 128>}, {pipeline_mode = #tpu.pipeline_mode<synchronous>, transform_indices = @transform_9, window_bounds = array<i64: 128, 128>}, {pipeline_mode = #tpu.pipeline_mode<synchronous>, transform_indices = @transform_10, window_bounds = array<i64: 1, 128>}, {transform_indices = @transform_11, window_bounds = array<i64: 8, 128>}, {transform_indices = @transform_12, window_bounds = array<i64: 8, 128>}]} {
    %c0 = arith.constant 0 : index
    %c0_0 = arith.constant 0 : index
    %0 = vector.load %arg1[%c0, %c0_0] : memref<8x512xf32, #tpu.memory_space<vmem>>, vector<8x512xf32>
    %1 = arith.truncf %0 : vector<8x512xf32> to vector<8x512xbf16>
    %c0_1 = arith.constant 0 : index
    %c0_2 = arith.constant 0 : index
    %2 = vector.load %arg2[%c0_1, %c0_2] : memref<512x256xbf16, #tpu.memory_space<vmem>>, vector<512x256xbf16>
    %cst = arith.constant dense<0.000000e+00> : vector<8x256xf32>
    %3 = tpu.matmul %1, %2, %cst {dimension_numbers = #tpu.dot_dimension_numbers<[1], [0], [0], [1], [0, 0, 1, 1], [], []>} : vector<8x512xbf16>, vector<512x256xbf16>, vector<8x256xf32> -> vector<8x256xf32>
    %c0_3 = arith.constant 0 : index
    %c0_4 = arith.constant 0 : index
    %4 = vector.load %arg3[%c0_3, %c0_4] : memref<1x256xf32, #tpu.memory_space<vmem>>, vector<1x256xf32>
    %5 = vector.broadcast %4 : vector<1x256xf32> to vector<8x256xf32>
    %6 = arith.addf %3, %5 : vector<8x256xf32>
    %7 = math.tanh %6 : vector<8x256xf32>
    %8 = arith.truncf %7 : vector<8x256xf32> to vector<8x256xbf16>
    %c0_5 = arith.constant 0 : index
    %c0_6 = arith.constant 0 : index
    %9 = vector.load %arg4[%c0_5, %c0_6] : memref<256x128xbf16, #tpu.memory_space<vmem>>, vector<256x128xbf16>
    %cst_7 = arith.constant dense<0.000000e+00> : vector<8x128xf32>
    %10 = tpu.matmul %8, %9, %cst_7 {dimension_numbers = #tpu.dot_dimension_numbers<[1], [0], [0], [1], [0, 0, 1, 1], [], []>} : vector<8x256xbf16>, vector<256x128xbf16>, vector<8x128xf32> -> vector<8x128xf32>
    %c0_8 = arith.constant 0 : index
    %c0_9 = arith.constant 0 : index
    %11 = vector.load %arg5[%c0_8, %c0_9] : memref<1x128xf32, #tpu.memory_space<vmem>>, vector<1x128xf32>
    %12 = vector.broadcast %11 : vector<1x128xf32> to vector<8x128xf32>
    %13 = arith.addf %10, %12 : vector<8x128xf32>
    %14 = math.tanh %13 : vector<8x128xf32>
    %15 = arith.truncf %14 : vector<8x128xf32> to vector<8x128xbf16>
    %c0_10 = arith.constant 0 : index
    %c0_11 = arith.constant 0 : index
    %16 = vector.load %arg6[%c0_10, %c0_11] : memref<128x128xbf16, #tpu.memory_space<vmem>>, vector<128x128xbf16>
    %cst_12 = arith.constant dense<0.000000e+00> : vector<8x128xf32>
    %17 = tpu.matmul %15, %16, %cst_12 {dimension_numbers = #tpu.dot_dimension_numbers<[1], [0], [0], [1], [0, 0, 1, 1], [], []>} : vector<8x128xbf16>, vector<128x128xbf16>, vector<8x128xf32> -> vector<8x128xf32>
    %c0_13 = arith.constant 0 : index
    %c0_14 = arith.constant 0 : index
    %18 = vector.load %arg7[%c0_13, %c0_14] : memref<1x128xf32, #tpu.memory_space<vmem>>, vector<1x128xf32>
    %19 = vector.broadcast %18 : vector<1x128xf32> to vector<8x128xf32>
    %20 = arith.addf %17, %19 : vector<8x128xf32>
    %21 = math.tanh %20 : vector<8x128xf32>
    %22 = arith.truncf %21 : vector<8x128xf32> to vector<8x128xbf16>
    %c0_15 = arith.constant 0 : index
    %c0_16 = arith.constant 0 : index
    %23 = vector.load %arg8[%c0_15, %c0_16] : memref<128x128xbf16, #tpu.memory_space<vmem>>, vector<128x128xbf16>
    %cst_17 = arith.constant dense<0.000000e+00> : vector<8x128xf32>
    %24 = tpu.matmul %22, %23, %cst_17 {dimension_numbers = #tpu.dot_dimension_numbers<[1], [0], [0], [1], [0, 0, 1, 1], [], []>} : vector<8x128xbf16>, vector<128x128xbf16>, vector<8x128xf32> -> vector<8x128xf32>
    %c0_18 = arith.constant 0 : index
    %c0_19 = arith.constant 0 : index
    %25 = vector.load %arg9[%c0_18, %c0_19] : memref<1x128xf32, #tpu.memory_space<vmem>>, vector<1x128xf32>
    %26 = vector.broadcast %25 : vector<1x128xf32> to vector<8x128xf32>
    %27 = arith.addf %24, %26 : vector<8x128xf32>
    %28 = math.tanh %27 : vector<8x128xf32>
    %c0_20 = arith.constant 0 : index
    %c0_21 = arith.constant 0 : index
    %29 = vector.load %arg10[%c0_20, %c0_21] : memref<128x128xbf16, #tpu.memory_space<vmem>>, vector<128x128xbf16>
    %cst_22 = arith.constant dense<0.000000e+00> : vector<8x128xf32>
    %30 = tpu.matmul %22, %29, %cst_22 {dimension_numbers = #tpu.dot_dimension_numbers<[1], [0], [0], [1], [0, 0, 1, 1], [], []>} : vector<8x128xbf16>, vector<128x128xbf16>, vector<8x128xf32> -> vector<8x128xf32>
    %c0_23 = arith.constant 0 : index
    %c0_24 = arith.constant 0 : index
    %31 = vector.load %arg11[%c0_23, %c0_24] : memref<1x128xf32, #tpu.memory_space<vmem>>, vector<1x128xf32>
    %32 = vector.broadcast %31 : vector<1x128xf32> to vector<8x128xf32>
    %33 = arith.addf %30, %32 : vector<8x128xf32>
    %34 = math.tanh %33 : vector<8x128xf32>
    %cst_25 = arith.constant 0.0499999933 : f32
    %35 = vector.broadcast %cst_25 : f32 to vector<8x128xf32>
    %36 = arith.mulf %35, %34 : vector<8x128xf32>
    %cst_26 = arith.constant 0.0500000045 : f32
    %37 = vector.broadcast %cst_26 : f32 to vector<8x128xf32>
    %38 = arith.addf %36, %37 : vector<8x128xf32>
    %cst_27 = arith.constant 5.000000e-01 : f32
    %39 = vector.broadcast %cst_27 : f32 to vector<8x128xf32>
    %40 = arith.mulf %39, %38 : vector<8x128xf32>
    %41 = math.exp %40 : vector<8x128xf32>
    %c0_28 = arith.constant 0 : index
    %c0_29 = arith.constant 0 : index
    %42 = vector.load %arg12[%c0_28, %c0_29] : memref<8x128xf32, #tpu.memory_space<vmem>>, vector<8x128xf32>
    %43 = arith.mulf %41, %42 : vector<8x128xf32>
    %44 = arith.addf %28, %43 : vector<8x128xf32>
    %45 = tpu.iota {dimensions = array<i32: 1>} : vector<8x128xi32>
    %c6_i32 = arith.constant 6 : i32
    %46 = vector.broadcast %c6_i32 : i32 to vector<8x128xi32>
    %47 = arith.cmpi slt, %45, %46 : vector<8x128xi32>
    %cst_30 = arith.constant 0.000000e+00 : f32
    %48 = vector.broadcast %cst_30 : f32 to vector<8x128xf32>
    %49 = arith.select %47, %38, %48 : vector<8x128xi1>, vector<8x128xf32>
    %50 = arith.mulf %42, %42 : vector<8x128xf32>
    %51 = arith.addf %50, %49 : vector<8x128xf32>
    %cst_31 = arith.constant dense<0.000000e+00> : vector<8xf32>
    %52 = vector.multi_reduction <add>, %51, %cst_31 [1] : vector<8x128xf32> to vector<8xf32>
    %53 = vector.shape_cast %52 : vector<8xf32> to vector<8x1xf32>
    %cst_32 = arith.constant 11.0272627 : f32
    %54 = vector.broadcast %cst_32 : f32 to vector<8x1xf32>
    %55 = arith.addf %53, %54 : vector<8x1xf32>
    %cst_33 = arith.constant -5.000000e-01 : f32
    %56 = vector.broadcast %cst_33 : f32 to vector<8x1xf32>
    %57 = arith.mulf %56, %55 : vector<8x1xf32>
    %c6_i32_34 = arith.constant 6 : i32
    %58 = vector.broadcast %c6_i32_34 : i32 to vector<8x128xi32>
    %59 = arith.cmpi eq, %45, %58 : vector<8x128xi32>
    %60 = vector.shape_cast %57 : vector<8x1xf32> to vector<8x1xf32>
    %61 = vector.broadcast %60 : vector<8x1xf32> to vector<8x128xf32>
    %62 = arith.select %59, %61, %44 : vector<8x128xi1>, vector<8x128xf32>
    %c0_35 = arith.constant 0 : index
    %c0_36 = arith.constant 0 : index
    %63 = vector.load %arg13[%c0_35, %c0_36] : memref<8x128xf32, #tpu.memory_space<vmem>>, vector<8x128xf32>
    tpu.vector_store %arg13[%c0_35, %c0_36], %62 {strides = array<i32>} : memref<8x128xf32, #tpu.memory_space<vmem>>, vector<8x128xf32>,
    return
  }
  func.func @transform_0(%arg0: i32) -> (i32, i32) {
    %c0_i32 = arith.constant 0 : i32
    %c0_i32_0 = arith.constant 0 : i32
    return %arg0, %c0_i32 : i32, i32
  }
  func.func @transform_1(%arg0: i32) -> (i32, i32) {
    %c0_i32 = arith.constant 0 : i32
    %c0_i32_0 = arith.constant 0 : i32
    %c0_i32_1 = arith.constant 0 : i32
    return %c0_i32, %c0_i32_0 : i32, i32
  }
  func.func @transform_2(%arg0: i32) -> (i32, i32) {
    %c0_i32 = arith.constant 0 : i32
    %c0_i32_0 = arith.constant 0 : i32
    %c0_i32_1 = arith.constant 0 : i32
    return %c0_i32, %c0_i32_0 : i32, i32
  }
  func.func @transform_3(%arg0: i32) -> (i32, i32) {
    %c0_i32 = arith.constant 0 : i32
    %c0_i32_0 = arith.constant 0 : i32
    %c0_i32_1 = arith.constant 0 : i32
    return %c0_i32, %c0_i32_0 : i32, i32
  }
  func.func @transform_4(%arg0: i32) -> (i32, i32) {
    %c0_i32 = arith.constant 0 : i32
    %c0_i32_0 = arith.constant 0 : i32
    %c0_i32_1 = arith.constant 0 : i32
    return %c0_i32, %c0_i32_0 : i32, i32
  }
  func.func @transform_5(%arg0: i32) -> (i32, i32) {
    %c0_i32 = arith.constant 0 : i32
    %c0_i32_0 = arith.constant 0 : i32
    %c0_i32_1 = arith.constant 0 : i32
    return %c0_i32, %c0_i32_0 : i32, i32
  }
  func.func @transform_6(%arg0: i32) -> (i32, i32) {
    %c0_i32 = arith.constant 0 : i32
    %c0_i32_0 = arith.constant 0 : i32
    %c0_i32_1 = arith.constant 0 : i32
    return %c0_i32, %c0_i32_0 : i32, i32
  }
  func.func @transform_7(%arg0: i32) -> (i32, i32) {
    %c0_i32 = arith.constant 0 : i32
    %c0_i32_0 = arith.constant 0 : i32
    %c0_i32_1 = arith.constant 0 : i32
    return %c0_i32, %c0_i32_0 : i32, i32
  }
  func.func @transform_8(%arg0: i32) -> (i32, i32) {
    %c0_i32 = arith.constant 0 : i32
    %c0_i32_0 = arith.constant 0 : i32
    %c0_i32_1 = arith.constant 0 : i32
    return %c0_i32, %c0_i32_0 : i32, i32
  }
  func.func @transform_9(%arg0: i32) -> (i32, i32) {
    %c0_i32 = arith.constant 0 : i32
    %c0_i32_0 = arith.constant 0 : i32
    %c0_i32_1 = arith.constant 0 : i32
    return %c0_i32, %c0_i32_0 : i32, i32
  }
  func.func @transform_10(%arg0: i32) -> (i32, i32) {
    %c0_i32 = arith.constant 0 : i32
    %c0_i32_0 = arith.constant 0 : i32
    %c0_i32_1 = arith.constant 0 : i32
    return %c0_i32, %c0_i32_0 : i32, i32
  }
  func.func @transform_11(%arg0: i32) -> (i32, i32) {
    %c0_i32 = arith.constant 0 : i32
    %c0_i32_0 = arith.constant 0 : i32
    return %arg0, %c0_i32 : i32, i32
  }
  func.func @transform_12(%arg0: i32) -> (i32, i32) {
    %c0_i32 = arith.constant 0 : i32
    %c0_i32_0 = arith.constant 0 : i32
    return %arg0, %c0_i32 : i32, i32
  }
}

</mosaic_0001>

<bundles_post_ra>
// kernel: tpu_custom_call.1
= control target key start
LH: loop header
LB: loop body
LE: loop exit
PB: predicated region body
PF: predicated region fallthrough
CT: control target
= control target key end

     0   :  { %17 = vsyncpa [#allocation3], 0  ;;  %s1940_s0 = inlined_call_operand.hbm [shape: f32[8,512], index: 0, kind: input, shape index: {}]   ;;  %s1941_s1 = inlined_call_operand.hbm [shape: bf16[512,256], index: 1, kind: input, shape index: {}]   ;;  %s1942_s2 = inlined_call_operand.vmem [shape: f32[1,256], index: 2, kind: input, shape index: {}]   ;;  %s1943_s3 = inlined_call_operand.hbm [shape: bf16[256,128], index: 3, kind: input, shape index: {}]   ;;  %s1944_s4 = inlined_call_operand.vmem [shape: f32[1,128], index: 4, kind: input, shape index: {}]   ;;  %s1945_s5 = inlined_call_operand.hbm [shape: bf16[128,128], index: 5, kind: input, shape index: {}]   ;;  %s1946_s6 = inlined_call_operand.vmem [shape: f32[1,128], index: 6, kind: input, shape index: {}]   ;;  %s1947_s7 = inlined_call_operand.hbm [shape: bf16[128,128], index: 7, kind: input, shape index: {}]   ;;  %s1948_s8 = inlined_call_operand.vmem [shape: f32[1,128], index: 8, kind: input, shape index: {}]   ;;  %s1949_s9 = inlined_call_operand.hbm [shape: bf16[128,128], index: 9, kind: input, shape index: {}]   ;;  %s1950_s10 = inlined_call_operand.vmem [shape: f32[1,128], index: 10, kind: input, shape index: {}]   ;;  %s1951_s11 = inlined_call_operand.vmem [shape: f32[8,128], index: 11, kind: input, shape index: {}]   ;;  %s1952_s12 = inlined_call_operand.hbm [shape: f32[8,128], index: 12, kind: output, shape index: {}]  }
   0x1   :  { %18 = vsyncpa [#allocation6], 0 }
   0x2   :  { %19 = vsyncpa [#allocation9], 0 }
   0x3   :  { %20 = vsyncpa [#allocation12], 0 }
   0x4   :  { %21 = vsyncpa [#allocation4], 0  ;;  %s1716_s21 = smov [#allocation5]   ;;  %s1552_s25 = scalar_lea.hbm %s1941_s1, 8192 }
   0x5   :  { %s37_s22 = sshll.u32 %s1716_s21, 4  ;;  %p1553_p0 = scmp.ne.s32.totalorder %s1941_s1, %s1552_s25  ;;  %s38_s22 = int_to_ptr.vmem [resolvable:$true] %s37_s22 }
   0x6   :  { %p1556_p1 = scmp.lt.u32.totalorder %s1552_s25, %s1941_s1 }
   0x8   :  { %p1558_p2 = pnand %p1556_p1, %p1553_p0 }
   0xa   :  { %1561 = shalt.err (!%p1558_p2)
}
   0xb   :  { %s1562_s30 = scalar_lea.vmem %s38_s22, 8192  ;;  %p1567_p4 = scmp.lt.s32.totalorder %s38_s22, %s38_s22 }
   0xc   :  { %p1563_p3 = scmp.ne.s32.totalorder %s38_s22, %s1562_s30  ;;  %p1568_p5 = scmp.lt.s32.totalorder %s1562_s30, %s1562_s30 }
   0xe   :  { %p1569_p6 = por %p1568_p5, %p1567_p4 }
  0x10   :  { %p1570_p7 = pnand %p1569_p6, %p1563_p3 }
  0x12   :  { %1573 = shalt.err (!%p1570_p7)
}
  0x13   :  { %s1717_s13 = smov 128   ;;  %s1718_s14 = smov 8  }
  0x14   :  { %43 = dma.hbm_to_vmem [thread:$0]  %s1941_s1, 8192, %s38_s22, [#allocation6], %s1717_s13, %s1717_s13, %s1718_s14  }
  0x15   :  { %s1719_s17 = smov [#allocation8]   ;;  %s1720_s19 = smov [#allocation2]  }
  0x16   :  { %s65_s18 = sshll.u32 %s1719_s17, 4  ;;  %s28_s20 = sshll.u32 %s1720_s19, 4  ;;  %s66_s18 = int_to_ptr.vmem [resolvable:$true] %s65_s18  ;;  %s29_s20 = int_to_ptr.vmem [resolvable:$true] %s28_s20 }
  0x17   :  { %s1574_s24 = scalar_lea.hbm %s1945_s5, 1024 }
  0x18   :  { %p1575_p8 = scmp.ne.s32.totalorder %s1945_s5, %s1574_s24  ;;  %p1578_p9 = scmp.lt.u32.totalorder %s1574_s24, %s1945_s5 }
  0x1a   :  { %p1580_p10 = pnand %p1578_p9, %p1575_p8 }
  0x1c   :  { %1583 = shalt.err (!%p1580_p10)
}
  0x1d   :  { %s1584_s1 = scalar_lea.vmem %s66_s18, 1024  ;;  %p1589_p12 = scmp.lt.s32.totalorder %s66_s18, %s66_s18 }
  0x1e   :  { %p1585_p11 = scmp.ne.s32.totalorder %s66_s18, %s1584_s1  ;;  %p1590_p13 = scmp.lt.s32.totalorder %s1584_s1, %s1584_s1 }
  0x20   :  { %p1591_p0 = por %p1590_p13, %p1589_p12 }
  0x22   :  { %p1592_p1 = pnand %p1591_p0, %p1585_p11 }
  0x24   :  { %1595 = shalt.err (!%p1592_p1)
}
  0x25   :  { %s1721_s22 = smov 64   ;;  %s1722_s29 = smov 4  }
  0x26   :  { %71 = dma.hbm_to_vmem [thread:$0]  %s1945_s5, 1024, %s66_s18, [#allocation9], %s1721_s22, %s1721_s22, %s1722_s29  }
  0x27   :  { %s1596_s16 = scalar_lea.hbm %s1940_s0, 512 }
  0x28   :  { %p1597_p2 = scmp.ne.s32.totalorder %s1940_s0, %s1596_s16  ;;  %p1600_p3 = scmp.lt.u32.totalorder %s1596_s16, %s1940_s0 }
  0x2a   :  { %p1602_p4 = pnand %p1600_p3, %p1597_p2 }
  0x2c   :  { %1605 = shalt.err (!%p1602_p4)
}
  0x2d   :  { %s1606_s24 = scalar_lea.vmem %s29_s20, 512  ;;  %p1611_p6 = scmp.lt.s32.totalorder %s29_s20, %s29_s20 }
  0x2e   :  { %p1607_p5 = scmp.ne.s32.totalorder %s29_s20, %s1606_s24  ;;  %p1612_p7 = scmp.lt.s32.totalorder %s1606_s24, %s1606_s24 }
  0x30   :  { %p1613_p8 = por %p1612_p7, %p1611_p6 }
  0x32   :  { %p1614_p9 = pnand %p1613_p8, %p1607_p5 }
  0x34   :  { %1617 = shalt.err (!%p1614_p9)
}
  0x35   :  { %31 = dma.hbm_to_vmem [thread:$0]  %s1940_s0, 512, %s29_s20, [#allocation3]  }
  0x36   :  { %s1723_s25 = smov [#allocation7]   ;;  %s1724_s27 = smov [#allocation10]  }
  0x37   :  { %s51_s26 = sshll.u32 %s1723_s25, 4  ;;  %s79_s28 = sshll.u32 %s1724_s27, 4  ;;  %s52_s26 = int_to_ptr.vmem [resolvable:$true] %s51_s26  ;;  %s80_s28 = int_to_ptr.vmem [resolvable:$true] %s79_s28 }
  0x38   :  { %s1618_s13 = scalar_lea.hbm %s1943_s3, 2048 }
  0x39   :  { %p1619_p10 = scmp.ne.s32.totalorder %s1943_s3, %s1618_s13  ;;  %p1622_p11 = scmp.lt.u32.totalorder %s1618_s13, %s1943_s3 }
  0x3b   :  { %p1624_p12 = pnand %p1622_p11, %p1619_p10 }
  0x3d   :  { %1627 = shalt.err (!%p1624_p12)
}
  0x3e   :  { %s1628_s0 = scalar_lea.vmem %s52_s26, 2048  ;;  %p1633_p0 = scmp.lt.s32.totalorder %s52_s26, %s52_s26 }
  0x3f   :  { %p1629_p13 = scmp.ne.s32.totalorder %s52_s26, %s1628_s0  ;;  %p1634_p1 = scmp.lt.s32.totalorder %s1628_s0, %s1628_s0 }
  0x41   :  { %p1635_p2 = por %p1634_p1, %p1633_p0 }
  0x43   :  { %p1636_p3 = pnand %p1635_p2, %p1629_p13 }
  0x45   :  { %1639 = shalt.err (!%p1636_p3)
}
  0x46   :  { %57 = dma.hbm_to_vmem [thread:$0]  %s1943_s3, 2048, %s52_s26, [#allocation6], %s1721_s22, %s1721_s22, %s1722_s29  }
  0x47   :  { %s1640_s24 = scalar_lea.hbm %s1947_s7, 1024 }
  0x48   :  { %p1641_p4 = scmp.ne.s32.totalorder %s1947_s7, %s1640_s24  ;;  %p1644_p5 = scmp.lt.u32.totalorder %s1640_s24, %s1947_s7 }
  0x4a   :  { %p1646_p6 = pnand %p1644_p5, %p1641_p4 }
  0x4c   :  { %1649 = shalt.err (!%p1646_p6)
}
  0x4d   :  { %s1650_s1 = scalar_lea.vmem %s80_s28, 1024  ;;  %p1655_p8 = scmp.lt.s32.totalorder %s80_s28, %s80_s28 }
  0x4e   :  { %p1651_p7 = scmp.ne.s32.totalorder %s80_s28, %s1650_s1  ;;  %p1656_p9 = scmp.lt.s32.totalorder %s1650_s1, %s1650_s1 }
  0x50   :  { %p1657_p10 = por %p1656_p9, %p1655_p8 }
  0x52   :  { %p1658_p11 = pnand %p1657_p10, %p1651_p7 }
  0x54   :  { %1661 = shalt.err (!%p1658_p11)
}
  0x55   :  { %85 = dma.hbm_to_vmem [thread:$0]  %s1947_s7, 1024, %s80_s28, [#allocation9], %s1721_s22, %s1721_s22, %s1722_s29  }
  0x56   :  { %s1725_s30 = smov [#allocation11]   ;;  %s1662_s16 = scalar_lea.hbm %s1949_s9, 1024 }
  0x57   :  { %s93_s13 = sshll.u32 %s1725_s30, 4  ;;  %p1663_p12 = scmp.ne.s32.totalorder %s1949_s9, %s1662_s16  ;;  %s94_s13 = int_to_ptr.vmem [resolvable:$true] %s93_s13 }
  0x58   :  { %p1666_p13 = scmp.lt.u32.totalorder %s1662_s16, %s1949_s9 }
  0x5a   :  { %p1668_p0 = pnand %p1666_p13, %p1663_p12 }
  0x5c   :  { %1671 = shalt.err (!%p1668_p0)
}
  0x5d   :  { %s1672_s21 = scalar_lea.vmem %s94_s13, 1024  ;;  %p1677_p2 = scmp.lt.s32.totalorder %s94_s13, %s94_s13 }
  0x5e   :  { %p1673_p1 = scmp.ne.s32.totalorder %s94_s13, %s1672_s21  ;;  %p1678_p3 = scmp.lt.s32.totalorder %s1672_s21, %s1672_s21 }
  0x60   :  { %p1679_p4 = por %p1678_p3, %p1677_p2 }
  0x62   :  { %p1680_p5 = pnand %p1679_p4, %p1673_p1 }
  0x64   :  { %1683 = shalt.err (!%p1680_p5)
}
  0x65   :  { %99 = dma.hbm_to_vmem [thread:$0]  %s1949_s9, 1024, %s94_s13, [#allocation12], %s1721_s22, %s1721_s22, %s1722_s29  }
  0x66   :  { %1706 = dma.done.wait [#allocation3], 512  }
  0x67   :  { %1707 = vsyncadd [#allocation3], 4294966784 }
  0x68   :  { %1708 = dma.done.wait [#allocation6], 10240  }
  0x69   :  { %1709 = vsyncadd [#allocation6], 4294957056 }
  0x6a   :  { %1710 = dma.done.wait [#allocation9], 2048  }
  0x6b   :  { %1711 = vsyncadd [#allocation9], 4294965248 }
  0x6c   :  { %1712 = dma.done.wait [#allocation12], 1024  }
  0x6d   :  { %1713 = vsyncadd [#allocation12], 4294966272  ;;  %v1402_v0 = vld [vmem:[#allocation5 + $0x4] ss:$8 sps:$4 sm:$0xff]   ;;  %v1404_v1 = vld [vmem:[#allocation5] ss:$8 sps:$4 sm:$0xff]  }
  0x6e   :  { %527 = vmatprep.subr.bf16.mxu0 %v1402_v0  ;;  %v1405_v2 = vld [vmem:[#allocation5 + $0x14] ss:$8 sps:$4 sm:$0xff]   ;;  %v1407_v3 = vld [vmem:[#allocation5 + $0x10] ss:$8 sps:$4 sm:$0xff]   ;;  %v1408_v4 = vld [vmem:[#allocation5 + $0x24] ss:$8 sps:$4 sm:$0xff]  }
  0x6f   :  { %528 = vmatpush1.bf16.msra.mxu0 %v1404_v1  ;;  %v1410_v5 = vld [vmem:[#allocation5 + $0x20] ss:$8 sps:$4 sm:$0xff]   ;;  %v1411_v6 = vld [vmem:[#allocation5 + $0x34] ss:$8 sps:$4 sm:$0xff]   ;;  %v1413_v7 = vld [vmem:[#allocation5 + $0x30] ss:$8 sps:$4 sm:$0xff]  }
  0x70   :  { %529 = vmatprep.subr.bf16.mxu0 %v1405_v2  ;;  %v1414_v8 = vld [vmem:[#allocation5 + $0x44] ss:$8 sps:$4 sm:$0xff]   ;;  %v1416_v9 = vld [vmem:[#allocation5 + $0x40] ss:$8 sps:$4 sm:$0xff]   ;;  %v1417_v10 = vld [vmem:[#allocation5 + $0x54] ss:$8 sps:$4 sm:$0xff]  }
  0x71   :  { %v1419_v11 = vld [vmem:[#allocation5 + $0x50] ss:$8 sps:$4 sm:$0xff]   ;;  %v1420_v12 = vld [vmem:[#allocation5 + $0x64] ss:$8 sps:$4 sm:$0xff]   ;;  %v1422_v15 = vld [vmem:[#allocation5 + $0x60] ss:$8 sps:$4 sm:$0xff]  }
  0x72   :  { %v124_v13 = vld [vmem:[#allocation2 + $0x8] sm:$0xff]  ;;  %v1423_v16 = vld [vmem:[#allocation5 + $0x74] ss:$8 sps:$4 sm:$0xff]   ;;  %v1425_v17 = vld [vmem:[#allocation5 + $0x70] ss:$8 sps:$4 sm:$0xff]   ;;  %vm1727_vm0 = vmmov 0  }
  0x73   :  { %530 = vmatpush1.bf16.msra.mxu0 %v1407_v3  ;;  %v128_v14 = vpack.c.bf16 %v124_v13, %v124_v13  ;;  %v1426_v18 = vld [vmem:[#allocation5 + $0x84] ss:$8 sps:$4 sm:$0xff]   ;;  %v1428_v19 = vld [vmem:[#allocation5 + $0x80] ss:$8 sps:$4 sm:$0xff]   ;;  %v1429_v20 = vld [vmem:[#allocation5 + $0x94] ss:$8 sps:$4 sm:$0xff]  }
  0x74   :  { %531 = vmatprep.subr.bf16.mxu0 %v1408_v4  ;;  %v1431_v21 = vld [vmem:[#allocation5 + $0x90] ss:$8 sps:$4 sm:$0xff]   ;;  %v1432_v22 = vld [vmem:[#allocation5 + $0xa4] ss:$8 sps:$4 sm:$0xff]   ;;  %v1434_v23 = vld [vmem:[#allocation5 + $0xa0] ss:$8 sps:$4 sm:$0xff]  }
  0x75   :  { %559 = vmatprep.mubr.bf16.mxu0 %v128_v14  ;;  %v1435_v24 = vld [vmem:[#allocation5 + $0xb4] ss:$8 sps:$4 sm:$0xff]   ;;  %v1437_v25 = vld [vmem:[#allocation5 + $0xb0] ss:$8 sps:$4 sm:$0xff]   ;;  %v1438_v26 = vld [vmem:[#allocation5 + $0xc4] ss:$8 sps:$4 sm:$0xff]  }
  0x76   :  { %v1498_v27 = vld [vmem:[#allocation7 + $0x40] sm:$0xff]   ;;  %v1441_v30 = vld [vmem:[#allocation5 + $0xd4] ss:$8 sps:$4 sm:$0xff]   ;;  %v1500_v31 = vld [vmem:[#allocation7 + $0x48] sm:$0xff]  }
  0x77   :  { %532 = vmatpush1.bf16.msra.mxu0 %v1410_v5  ;;  %v1440_v28 = vld [vmem:[#allocation5 + $0xc0] ss:$8 sps:$4 sm:$0xff]   ;;  %1274 = vmatprep.subr.bf16.mxu1 %v1498_v27  ;;  %v1502_v33 = vld [vmem:[#allocation7 + $0x50] sm:$0xff]   ;;  %v1444_v35 = vld [vmem:[#allocation5 + $0xe4] ss:$8 sps:$4 sm:$0xff]  }
  0x78   :  { %533 = vmatprep.subr.bf16.mxu0 %v1411_v6  ;;  %v1499_v29 = vld [vmem:[#allocation7] sm:$0xff]   ;;  %v1501_v32 = vld [vmem:[#allocation7 + $0x8] sm:$0xff]   ;;  %v1443_v34 = vld [vmem:[#allocation5 + $0xd0] ss:$8 sps:$4 sm:$0xff]  }
  0x79   :  { %1275 = vmatpush3.bf16.msra.mxu1 %v1499_v29  ;;  %v1503_v36 = vld [vmem:[#allocation7 + $0x10] sm:$0xff]   ;;  %v1504_v37 = vld [vmem:[#allocation7 + $0x58] sm:$0xff]   ;;  %v1446_v38 = vld [vmem:[#allocation5 + $0xe0] ss:$8 sps:$4 sm:$0xff]  }
  0x7a   :  { %1276 = vmatprep.subr.bf16.mxu1 %v1500_v31  ;;  %v1505_v39 = vld [vmem:[#allocation7 + $0x18] sm:$0xff]   ;;  %v123_v42 = vld [vmem:[#allocation2] sm:$0xff]  ;;  %v125_v14 = vld [vmem:[#allocation2 + $0x10] sm:$0xff] }
  0x7b   :  { %534 = vmatpush1.bf16.msra.mxu0 %v1413_v7  ;;  %v1447_v40 = vld [vmem:[#allocation5 + $0xf4] ss:$8 sps:$4 sm:$0xff]   ;;  %v1449_v41 = vld [vmem:[#allocation5 + $0xf0] ss:$8 sps:$4 sm:$0xff]   ;;  %v1452_v43 = vld [vmem:[#allocation5 + $0x104] ss:$8 sps:$4 sm:$0xff]   ;;  %v127_v46 = vpack.c.bf16 %v123_v42, %v123_v42 }
  0x7c   :  { %535 = vmatprep.subr.bf16.mxu0 %v1414_v8  ;;  %v126_v44 = vld [vmem:[#allocation2 + $0x18] sm:$0xff]  ;;  %v1450_v45 = vld [vmem:[#allocation5 + $0x100] ss:$8 sps:$4 sm:$0xff]   ;;  %v1458_v50 = vld [vmem:[#allocation5 + $0x124] ss:$8 sps:$4 sm:$0xff]  }
  0x7d   :  { %1277 = vmatpush3.bf16.msra.mxu1 %v1501_v32  ;;  %v1455_v47 = vld [vmem:[#allocation5 + $0x114] ss:$8 sps:$4 sm:$0xff]   ;;  %v130_v48 = vpack.c.bf16 %v126_v44, %v126_v44  ;;  %v1453_v49 = vld [vmem:[#allocation5 + $0x110] ss:$8 sps:$4 sm:$0xff]   ;;  %v1456_v51 = vld [vmem:[#allocation5 + $0x120] ss:$8 sps:$4 sm:$0xff]  }
  0x7e   :  { %1278 = vmatprep.subr.bf16.mxu1 %v1502_v33  ;;  %v1461_v52 = vld [vmem:[#allocation5 + $0x134] ss:$8 sps:$4 sm:$0xff]   ;;  %v1459_v53 = vld [vmem:[#allocation5 + $0x130] ss:$8 sps:$4 sm:$0xff]   ;;  %v1464_v54 = vld [vmem:[#allocation5 + $0x144] ss:$8 sps:$4 sm:$0xff]  }
  0x7f   :  { %536 = vmatpush1.bf16.msra.mxu0 %v1416_v9  ;;  %v1462_v55 = vld [vmem:[#allocation5 + $0x140] ss:$8 sps:$4 sm:$0xff]   ;;  %v1467_v56 = vld [vmem:[#allocation5 + $0x154] ss:$8 sps:$4 sm:$0xff]   ;;  %v1465_v57 = vld [vmem:[#allocation5 + $0x150] ss:$8 sps:$4 sm:$0xff]  }
  0x80   :  { %537 = vmatprep.subr.bf16.mxu0 %v1417_v10  ;;  %v1470_v58 = vld [vmem:[#allocation5 + $0x164] ss:$8 sps:$4 sm:$0xff]   ;;  %v1468_v59 = vld [vmem:[#allocation5 + $0x160] ss:$8 sps:$4 sm:$0xff]   ;;  %v1473_v60 = vld [vmem:[#allocation5 + $0x174] ss:$8 sps:$4 sm:$0xff]  }
  0x81   :  { %1279 = vmatpush3.bf16.msra.mxu1 %v1503_v36  ;;  %v1471_v61 = vld [vmem:[#allocation5 + $0x170] ss:$8 sps:$4 sm:$0xff]   ;;  %v1476_v62 = vld [vmem:[#allocation5 + $0x184] ss:$8 sps:$4 sm:$0xff]   ;;  %v1474_v63 = vld [vmem:[#allocation5 + $0x180] ss:$8 sps:$4 sm:$0xff]  }
  0x82   :  { %1280 = vmatprep.subr.bf16.mxu1 %v1504_v37  ;;  %v1479_v0 = vld [vmem:[#allocation5 + $0x194] ss:$8 sps:$4 sm:$0xff]   ;;  %v1477_v1 = vld [vmem:[#allocation5 + $0x190] ss:$8 sps:$4 sm:$0xff]   ;;  %v1482_v2 = vld [vmem:[#allocation5 + $0x1a4] ss:$8 sps:$4 sm:$0xff]  }
  0x83   :  { %538 = vmatpush1.bf16.msra.mxu0 %v1419_v11  ;;  %v1480_v3 = vld [vmem:[#allocation5 + $0x1a0] ss:$8 sps:$4 sm:$0xff]   ;;  %v1485_v4 = vld [vmem:[#allocation5 + $0x1b4] ss:$8 sps:$4 sm:$0xff]   ;;  %v1483_v5 = vld [vmem:[#allocation5 + $0x1b0] ss:$8 sps:$4 sm:$0xff]  }
  0x84   :  { %539 = vmatprep.subr.bf16.mxu0 %v1420_v12  ;;  %v1488_v6 = vld [vmem:[#allocation5 + $0x1c4] ss:$8 sps:$4 sm:$0xff]   ;;  %v1486_v7 = vld [vmem:[#allocation5 + $0x1c0] ss:$8 sps:$4 sm:$0xff]   ;;  %v1491_v8 = vld [vmem:[#allocation5 + $0x1d4] ss:$8 sps:$4 sm:$0xff]  }
  0x85   :  { %1281 = vmatpush3.bf16.msra.mxu1 %v1505_v39  ;;  %v1489_v9 = vld [vmem:[#allocation5 + $0x1d0] ss:$8 sps:$4 sm:$0xff]   ;;  %v1494_v10 = vld [vmem:[#allocation5 + $0x1e4] ss:$8 sps:$4 sm:$0xff]   ;;  %v1492_v11 = vld [vmem:[#allocation5 + $0x1e0] ss:$8 sps:$4 sm:$0xff]  }
  0x86   :  { %v1497_v12 = vld [vmem:[#allocation5 + $0x1f4] ss:$8 sps:$4 sm:$0xff]   ;;  %v1495_v13 = vld [vmem:[#allocation5 + $0x1f0] ss:$8 sps:$4 sm:$0xff]  }
  0x87   :  { %540 = vmatpush1.bf16.msra.mxu0 %v1422_v15  ;;  %v129_v15 = vpack.c.bf16 %v125_v14, %v125_v14  ;;  %v1516_v44 = vld [vmem:[#allocation8 + $0x10] sm:$0xff]   ;;  %v1533_v14 = vld [vmem:[#allocation11 + $0x18] sm:$0xff]  }
  0x88   :  { %541 = vmatprep.subr.bf16.mxu0 %v1423_v16  ;;  %v1506_v16 = vld [vmem:[#allocation7 + $0x60] sm:$0xff]  }
  0x89   :  { %1282 = vmatprep.subr.bf16.mxu1 %v1506_v16  ;;  %v1535_v16 = vld [vmem:[#allocation11 + $0x28] sm:$0xff]  }
  0x8b   :  { %542 = vmatpush1.bf16.msra.mxu0 %v1425_v17  ;;  %v1507_v17 = vld [vmem:[#allocation7 + $0x20] sm:$0xff]  }
  0x8c   :  { %543 = vmatprep.subr.bf16.mxu0 %v1426_v18  ;;  %1283 = vmatpush3.bf16.msra.mxu1 %v1507_v17  ;;  %v1508_v18 = vld [vmem:[#allocation7 + $0x68] sm:$0xff]   ;;  %v1536_v17 = vld [vmem:[#allocation11 + $0x30] sm:$0xff]  }
  0x8d   :  { %1284 = vmatprep.subr.bf16.mxu1 %v1508_v18  ;;  %v1537_v18 = vld [vmem:[#allocation11 + $0x38] sm:$0xff]  }
  0x8f   :  { %544 = vmatpush1.bf16.msra.mxu0 %v1428_v19  ;;  %v1509_v19 = vld [vmem:[#allocation7 + $0x28] sm:$0xff]  }
  0x90   :  { %545 = vmatprep.subr.bf16.mxu0 %v1429_v20  ;;  %1285 = vmatpush3.bf16.msra.mxu1 %v1509_v19  ;;  %v1510_v20 = vld [vmem:[#allocation7 + $0x70] sm:$0xff]  }
  0x91   :  { %1286 = vmatprep.subr.bf16.mxu1 %v1510_v20 }
  0x93   :  { %546 = vmatpush1.bf16.msra.mxu0 %v1431_v21  ;;  %v1511_v21 = vld [vmem:[#allocation7 + $0x30] sm:$0xff]  }
  0x94   :  { %547 = vmatprep.subr.bf16.mxu0 %v1432_v22  ;;  %1287 = vmatpush3.bf16.msra.mxu1 %v1511_v21  ;;  %v1512_v22 = vld [vmem:[#allocation7 + $0x78] sm:$0xff]  }
  0x95   :  { %1288 = vmatprep.subr.bf16.mxu1 %v1512_v22 }
  0x97   :  { %548 = vmatpush1.bf16.msra.mxu0 %v1434_v23  ;;  %v1513_v23 = vld [vmem:[#allocation7 + $0x38] sm:$0xff]  }
  0x98   :  { %549 = vmatprep.subr.bf16.mxu0 %v1435_v24  ;;  %1289 = vmatpush3.bf16.msra.mxu1 %v1513_v23  ;;  %v1726_v24 = vmov 0.0   ;;  %v1265_v23 = vld [vmem:[%s1950_s10] ss:$0 sm:$0xff]  ;;  %s1728_s10 = smov [#allocation13]  }
  0x99   :  { %1323 = vmatprep.subr.bf16.mxu1 %v1726_v24 }
  0x9b   :  { %550 = vmatpush1.bf16.msra.mxu0 %v1437_v25  ;;  %v197_v25 = vlaneseq }
  0x9c   :  { %551 = vmatprep.subr.bf16.mxu0 %v1438_v26 }
  0x9d   :  { %v198_v26 = vshrl.u32 %v197_v25, 7 }
  0x9f   :  { %552 = vmatpush1.bf16.msra.mxu0 %v1440_v28  ;;  %v199_v27 = vsub.s32 0, %v198_v26  ;;  %v195_v28 = vld [vmem:[%s1942_s2] sm:$0x3]  ;;  %v203_v29 = vsub.s32 1, %v198_v26 }
  0xa0   :  { %553 = vmatprep.subr.bf16.mxu0 %v1441_v30 }
  0xa1   :  { %v200_v30 = vrot.slane %v195_v28, %v199_v27  ;;  %v204_v31 = vrot.slane %v195_v28, %v203_v29 }
  0xa3   :  { %554 = vmatpush1.bf16.msra.mxu0 %v1443_v34 }
  0xa4   :  { %555 = vmatprep.subr.bf16.mxu0 %v1444_v35 }
  0xa7   :  { %556 = vmatpush1.bf16.msra.mxu0 %v1446_v38 }
  0xa8   :  { %557 = vmatprep.subr.bf16.mxu0 %v1447_v40 }
  0xab   :  { %558 = vmatpush1.bf16.msra.mxu0 %v1449_v41  ;;  %v1514_v41 = vld [vmem:[#allocation8] sm:$0xff]  }
  0xac   :  { %568 = vmatprep.subr.bf16.mxu0 %v1452_v43  ;;  %v1515_v43 = vld [vmem:[#allocation8 + $0x8] sm:$0xff]  }
  0xae   :  { %560 = vmatmul.mubr.bf16.vlgmr.msra.gmra.mrb[0].mxu0 %v127_v46  ;;  %v1518_v46 = vld [vmem:[#allocation8 + $0x20] sm:$0xff]  }
  0xaf   :  { %569 = vmatpush1.bf16.msra.mxu0 %v1450_v45  ;;  %600 = vmatprep.mubr.bf16.mxu0 %v130_v48  ;;  %v1517_v45 = vld [vmem:[#allocation8 + $0x18] sm:$0xff]   ;;  %v1520_v48 = vld [vmem:[#allocation8 + $0x30] sm:$0xff]  }
  0xb0   :  { %570 = vmatprep.subr.bf16.mxu0 %v1455_v47  ;;  %v1519_v47 = vld [vmem:[#allocation8 + $0x28] sm:$0xff]  }
  0xb3   :  { %571 = vmatpush1.bf16.msra.mxu0 %v1453_v49  ;;  %v1521_v49 = vld [vmem:[#allocation8 + $0x38] sm:$0xff]  }
  0xb4   :  { %572 = vmatprep.subr.bf16.mxu0 %v1458_v50 }
  0xb7   :  { %573 = vmatpush1.bf16.msra.mxu0 %v1456_v51  ;;  %v1230_v51 = vld [vmem:[%s1944_s4] ss:$0 sm:$0xff] }
  0xb8   :  { %574 = vmatprep.subr.bf16.mxu0 %v1461_v52 }
  0xbb   :  { %575 = vmatpush1.bf16.msra.mxu0 %v1459_v53 }
  0xbc   :  { %576 = vmatprep.subr.bf16.mxu0 %v1464_v54 }
  0xbf   :  { %577 = vmatpush1.bf16.msra.mxu0 %v1462_v55 }
  0xc0   :  { %578 = vmatprep.subr.bf16.mxu0 %v1467_v56 }
  0xc3   :  { %579 = vmatpush1.bf16.msra.mxu0 %v1465_v57 }
  0xc4   :  { %580 = vmatprep.subr.bf16.mxu0 %v1470_v58  ;;  %v1522_v58 = vld [vmem:[#allocation10] sm:$0xff]  }
  0xc7   :  { %581 = vmatpush1.bf16.msra.mxu0 %v1468_v59 }
  0xc8   :  { %582 = vmatprep.subr.bf16.mxu0 %v1473_v60  ;;  %v1523_v60 = vld [vmem:[#allocation10 + $0x8] sm:$0xff]  }
  0xcb   :  { %583 = vmatpush1.bf16.msra.mxu0 %v1471_v61  ;;  %v1524_v61 = vld [vmem:[#allocation10 + $0x10] sm:$0xff]  }
  0xcc   :  { %584 = vmatprep.subr.bf16.mxu0 %v1476_v62  ;;  %v1525_v62 = vld [vmem:[#allocation10 + $0x18] sm:$0xff]  }
  0xcf   :  { %585 = vmatpush1.bf16.msra.mxu0 %v1474_v63  ;;  %v1526_v63 = vld [vmem:[#allocation10 + $0x20] sm:$0xff]  }
  0xd0   :  { %586 = vmatprep.subr.bf16.mxu0 %v1479_v0  ;;  %v1527_v0 = vld [vmem:[#allocation10 + $0x28] sm:$0xff]  }
  0xd3   :  { %587 = vmatpush1.bf16.msra.mxu0 %v1477_v1  ;;  %v1528_v1 = vld [vmem:[#allocation10 + $0x30] sm:$0xff]  }
  0xd4   :  { %588 = vmatprep.subr.bf16.mxu0 %v1482_v2  ;;  %v1529_v2 = vld [vmem:[#allocation10 + $0x38] sm:$0xff]  }
  0xd7   :  { %589 = vmatpush1.bf16.msra.mxu0 %v1480_v3  ;;  %v1247_v3 = vld [vmem:[%s1946_s6] ss:$0 sm:$0xff] }
  0xd8   :  { %590 = vmatprep.subr.bf16.mxu0 %v1485_v4 }
  0xdb   :  { %591 = vmatpush1.bf16.msra.mxu0 %v1483_v5 }
  0xdc   :  { %592 = vmatprep.subr.bf16.mxu0 %v1488_v6 }
  0xdf   :  { %593 = vmatpush1.bf16.msra.mxu0 %v1486_v7 }
  0xe0   :  { %594 = vmatprep.subr.bf16.mxu0 %v1491_v8 }
  0xe3   :  { %595 = vmatpush1.bf16.msra.mxu0 %v1489_v9 }
  0xe4   :  { %596 = vmatprep.subr.bf16.mxu0 %v1494_v10  ;;  %v1530_v10 = vld [vmem:[#allocation11] sm:$0xff]  }
  0xe7   :  { %597 = vmatpush1.bf16.msra.mxu0 %v1492_v11 }
  0xe8   :  { %598 = vmatprep.subr.bf16.mxu0 %v1497_v12  ;;  %v1531_v12 = vld [vmem:[#allocation11 + $0x8] sm:$0xff]  }
  0xeb   :  { %599 = vmatpush1.bf16.msra.mxu0 %v1495_v13  ;;  %v1532_v13 = vld [vmem:[#allocation11 + $0x10] sm:$0xff]  }
  0xee   :  { %601 = vmatmul.mubr.bf16.vlgmr.msra.gmra.mrb[0].mxu0 %v129_v15  ;;  %v1534_v15 = vld [vmem:[#allocation11 + $0x20] sm:$0xff]  }
 0x1c1   :  { %v602_v32 = vpop.f32.mrb[0].mxu0 }
 0x1c2   :  { %v1383_v33 = vadd.f32 %v602_v32, %v200_v30  ;;  %v604_v34 = vpop.f32.mrb[1].mxu0 }
 0x1c3   :  { %v1384_v35 = vadd.f32 %v604_v34, %v204_v31  ;;  %v606_v36 = vpop.f32.mrb[2].mxu0  ;;  %v1136_v31 = vand.u32 127, %v197_v25 }
 0x1c4   :  { %1538 = vtanh.f32 %v1383_v33  ;;  %v607_v37 = vpop.f32.mrb[3].mxu0  ;;  %v1256_v36 = vld [vmem:[%s1948_s8] ss:$0 sm:$0xff] }
 0x1c5   :  { %1540 = vtanh.f32 %v1384_v35  ;;  %vm1137_vm1 = vcmp.lt.s32.totalorder %v1136_v31, 6  ;;  %vm1145_vm2 = vcmp.eq.s32.totalorder %v1136_v31, 6 }
 0x1ce   :  { %v1539_v38 = vpop.eup %1538 }
 0x1cf   :  { %v1541_v39 = vpop.eup %1540  ;;  %v611_v42 = vpack.c.bf16 %v1539_v38, %v1539_v38 }
 0x1d0   :  { %v612_v40 = vpack.c.bf16 %v1541_v39, %v1541_v39 }
 0x1d2   :  { %780 = vmatprep.mubr.bf16.mxu1 %v612_v40 }
 0x1d3   :  { %781 = vmatmul.mubr.bf16.vlgmr.msra.gmra.mrb[0].mxu1 %v611_v42 }
 0x1d4   :  { %1324 = vmatpush3.bf16.msra.mxu1 %v1514_v41  ;;  %1339 = vmatprep.mubr.msk.bf16.mxu1 %vm1727_vm0, %v1726_v24 }
 0x1d5   :  { %1325 = vmatprep.subr.bf16.mxu1 %v1726_v24 }
 0x1d8   :  { %1326 = vmatpush3.bf16.msra.mxu1 %v1515_v43 }
 0x1d9   :  { %1327 = vmatprep.subr.bf16.mxu1 %v1726_v24 }
 0x1dc   :  { %1328 = vmatpush3.bf16.msra.mxu1 %v1516_v44 }
 0x1dd   :  { %1329 = vmatprep.subr.bf16.mxu1 %v1726_v24 }
 0x1e0   :  { %1330 = vmatpush3.bf16.msra.mxu1 %v1517_v45 }
 0x1e1   :  { %1331 = vmatprep.subr.bf16.mxu1 %v1726_v24 }
 0x1e4   :  { %1332 = vmatpush3.bf16.msra.mxu1 %v1518_v46 }
 0x1e5   :  { %1333 = vmatprep.subr.bf16.mxu1 %v1726_v24 }
 0x1e8   :  { %1334 = vmatpush3.bf16.msra.mxu1 %v1519_v47 }
 0x1e9   :  { %1335 = vmatprep.subr.bf16.mxu1 %v1726_v24 }
 0x1ec   :  { %1336 = vmatpush3.bf16.msra.mxu1 %v1520_v48 }
 0x1ed   :  { %1337 = vmatprep.subr.bf16.mxu1 %v1726_v24 }
 0x1f0   :  { %1338 = vmatpush3.bf16.msra.mxu1 %v1521_v49 }
 0x1f1   :  { %1343 = vmatprep.subr.bf16.mxu1 %v1726_v24 }
 0x2a6   :  { %v1290_v50 = vpop.f32.mrb[0].mxu1 }
 0x2a7   :  { %v1291_v52 = vpop.f32.mrb[1].mxu1 }
 0x2a8   :  { %v1292_v53 = vadd.f32 %v1291_v52, %v1290_v50  ;;  %v1293_v54 = vpop.f32.mrb[2].mxu1 }
 0x2a9   :  { %v1294_v55 = vpop.f32.mrb[3].mxu1 }
 0x2aa   :  { %v783_v56 = vadd.f32 %v1292_v53, %v1230_v51 }
 0x2ac   :  { %1542 = vtanh.f32 %v783_v56 }
 0x2b6   :  { %v1543_v57 = vpop.eup %1542 }
 0x2b7   :  { %v789_v59 = vpack.c.bf16 %v1543_v57, %v1543_v57 }
 0x2b9   :  { %1340 = vmatmul.mubr.bf16.vlgmr.msra.gmra.mrb[4].mxu1 %v789_v59 }
 0x2ba   :  { %1344 = vmatpush3.bf16.msra.mxu1 %v1522_v58  ;;  %1359 = vmatprep.mubr.msk.bf16.mxu1 %vm1727_vm0, %v1726_v24 }
 0x2bb   :  { %1345 = vmatprep.subr.bf16.mxu1 %v1726_v24 }
 0x2be   :  { %1346 = vmatpush3.bf16.msra.mxu1 %v1523_v60 }
 0x2bf   :  { %1347 = vmatprep.subr.bf16.mxu1 %v1726_v24 }
 0x2c2   :  { %1348 = vmatpush3.bf16.msra.mxu1 %v1524_v61 }
 0x2c3   :  { %1349 = vmatprep.subr.bf16.mxu1 %v1726_v24 }
 0x2c6   :  { %1350 = vmatpush3.bf16.msra.mxu1 %v1525_v62 }
 0x2c7   :  { %1351 = vmatprep.subr.bf16.mxu1 %v1726_v24 }
 0x2ca   :  { %1352 = vmatpush3.bf16.msra.mxu1 %v1526_v63 }
 0x2cb   :  { %1353 = vmatprep.subr.bf16.mxu1 %v1726_v24 }
 0x2ce   :  { %1354 = vmatpush3.bf16.msra.mxu1 %v1527_v0 }
 0x2cf   :  { %1355 = vmatprep.subr.bf16.mxu1 %v1726_v24 }
 0x2d2   :  { %1356 = vmatpush3.bf16.msra.mxu1 %v1528_v1 }
 0x2d3   :  { %1357 = vmatprep.subr.bf16.mxu1 %v1726_v24 }
 0x2d6   :  { %1358 = vmatpush3.bf16.msra.mxu1 %v1529_v2 }
 0x2d7   :  { %1363 = vmatprep.subr.bf16.mxu1 %v1726_v24 }
 0x38c   :  { %v895_v4 = vpop.f32.mrb[4].mxu1 }
 0x38d   :  { %v896_v5 = vadd.f32 %v1247_v3, %v895_v4  ;;  %v1341_v6 = vpop.f32.mrb[5].mxu1 }
 0x38e   :  { %v898_v7 = vpop.f32.mrb[6].mxu1 }
 0x38f   :  { %1544 = vtanh.f32 %v896_v5  ;;  %v1342_v8 = vpop.f32.mrb[7].mxu1 }
 0x399   :  { %v1545_v9 = vpop.eup %1544 }
 0x39a   :  { %v902_v11 = vpack.c.bf16 %v1545_v9, %v1545_v9 }
 0x39c   :  { %1360 = vmatmul.mubr.bf16.vlgmr.msra.gmra.mrb[8].mxu1 %v902_v11 }
 0x39d   :  { %1364 = vmatpush3.bf16.msra.mxu1 %v1530_v10  ;;  %1379 = vmatprep.mubr.msk.bf16.mxu1 %vm1727_vm0, %v1726_v24 }
 0x39e   :  { %1365 = vmatprep.subr.bf16.mxu1 %v1726_v24 }
 0x3a1   :  { %1366 = vmatpush3.bf16.msra.mxu1 %v1531_v12 }
 0x3a2   :  { %1367 = vmatprep.subr.bf16.mxu1 %v1726_v24 }
 0x3a5   :  { %1368 = vmatpush3.bf16.msra.mxu1 %v1532_v13 }
 0x3a6   :  { %1369 = vmatprep.subr.bf16.mxu1 %v1726_v24 }
 0x3a9   :  { %1370 = vmatpush3.bf16.msra.mxu1 %v1533_v14 }
 0x3aa   :  { %1371 = vmatprep.subr.bf16.mxu1 %v1726_v24 }
 0x3ad   :  { %1372 = vmatpush3.bf16.msra.mxu1 %v1534_v15 }
 0x3ae   :  { %1373 = vmatprep.subr.bf16.mxu1 %v1726_v24 }
 0x3b1   :  { %1374 = vmatpush3.bf16.msra.mxu1 %v1535_v16 }
 0x3b2   :  { %1375 = vmatprep.subr.bf16.mxu1 %v1726_v24 }
 0x3b5   :  { %1376 = vmatpush3.bf16.msra.mxu1 %v1536_v17 }
 0x3b6   :  { %1377 = vmatprep.subr.bf16.mxu1 %v1726_v24  ;;  %v1132_v24 = vld [vmem:[%s1951_s11] sm:$0xff]  ;;  %s1154_s11 = sshll.u32 %s1728_s10, 4  ;;  %s1155_s11 = int_to_ptr.vmem [resolvable:$true] %s1154_s11 }
 0x3b7   :  { %v1139_v34 = vmul.f32 %v1132_v24, %v1132_v24  ;;  %s1684_s8 = scalar_lea.vmem %s1155_s11, 128  ;;  %p1689_p7 = scmp.lt.s32.totalorder %s1155_s11, %s1155_s11 }
 0x3b8   :  { %p1685_p6 = scmp.ne.s32.totalorder %s1155_s11, %s1684_s8  ;;  %p1690_p8 = scmp.lt.s32.totalorder %s1684_s8, %s1684_s8 }
 0x3b9   :  { %1378 = vmatpush3.bf16.msra.mxu1 %v1537_v18 }
 0x3ba   :  { %p1691_p9 = por %p1690_p8, %p1689_p7 }
 0x3bc   :  { %1380 = vmatmul.mubr.bf16.vlgmr.msra.gmra.mrb[12].mxu1 %v902_v11  ;;  %p1692_p10 = pnand %p1691_p9, %p1685_p6 }
 0x46f   :  { %v1008_v19 = vpop.f32.mrb[8].mxu1 }
 0x470   :  { %v1361_v20 = vpop.f32.mrb[9].mxu1  ;;  %v1009_v40 = vadd.f32 %v1256_v36, %v1008_v19 }
 0x471   :  { %v1011_v21 = vpop.f32.mrb[10].mxu1 }
 0x472   :  { %v1362_v22 = vpop.f32.mrb[11].mxu1 }
 0x48f   :  { %v1120_v26 = vpop.f32.mrb[12].mxu1 }
 0x490   :  { %v1121_v27 = vadd.f32 %v1265_v23, %v1120_v26  ;;  %v1381_v28 = vpop.f32.mrb[13].mxu1 }
 0x491   :  { %v1123_v29 = vpop.f32.mrb[14].mxu1 }
 0x492   :  { %1546 = vtanh.f32 %v1121_v27  ;;  %v1382_v30 = vpop.f32.mrb[15].mxu1 }
 0x49c   :  { %v1547_v32 = vpop.eup %1546 }
 0x49d   :  { %v1127_v33 = vmul.f32 0.049999993, %v1547_v32 }
 0x49f   :  { %v1128_v35 = vadd.f32 0.050000004, %v1127_v33 }
 0x4a1   :  { %v1129_v37 = vmul.f32 0.5, %v1128_v35  ;;  %v1138_v38 = vsel %vm1137_vm1, %v1128_v35, 0.0 }
 0x4a2   :  { %v1140_v39 = vadd.f32 %v1139_v34, %v1138_v38 }
 0x4a3   :  { %v1130_v41 = vmul.f32 1.442695, %v1129_v37 }
 0x4a4   :  { %1141 = vadd.xlane.f32.xlu0 %v1140_v39 }
 0x4a5   :  { %1548 = vpow2.f32 %v1130_v41 }
 0x4a6   :  { %1550 = vtanh.f32 %v1009_v40 }
 0x4af   :  { %v1549_v25 = vpop.eup %1548 }
 0x4b0   :  { %v1133_v42 = vmul.f32 %v1549_v25, %v1132_v24  ;;  %v1551_v43 = vpop.eup %1550 }
 0x4b2   :  { %v1134_v44 = vadd.f32 %v1551_v43, %v1133_v42 }
 0x531   :  { %v1142_v45 = vpop.xlane.xlu0 %1141 }
 0x532   :  { %v1143_v46 = vadd.f32 11.027263, %v1142_v45 }
 0x534   :  { %v1144_v47 = vmul.f32 -0.5, %v1143_v46 }
 0x536   :  { %v1146_v48 = vsel %vm1145_vm2, %v1144_v47, %v1134_v44 }
 0x537   :  { %1147 = vst [vmem:[#allocation13] sm:$0xff] %v1146_v48 }
 0x538   :  { %1695 = shalt.err (!%p1692_p10)
}
 0x539   :  { %s1696_s26 = scalar_lea.hbm %s1952_s12, 128 }
 0x53a   :  { %p1697_p11 = scmp.ne.s32.totalorder %s1952_s12, %s1696_s26  ;;  %p1700_p12 = scmp.lt.u32.totalorder %s1696_s26, %s1952_s12 }
 0x53c   :  { %p1702_p13 = pnand %p1700_p12, %p1697_p11 }
 0x53e   :  { %1705 = shalt.err (!%p1702_p13)
}
 0x53f   :  { %1157 = dma.vmem_to_hbm [thread:$0]  %s1155_s11, 128, %s1952_s12, [#allocation4]  }
 0x540   :  { %1714 = dma.done.wait [#allocation4], 128  }
 0x541   :  { %1715 = vsyncadd [#allocation4], 4294967168 }
 0x542   :  { %1161 = vsyncpa [#allocation3], 1 }
 0x543   :  { %1162 = vsyncpa [#allocation6], 1 }
 0x544   :  { %1163 = vsyncpa [#allocation9], 1 }
 0x545   :  { %1164 = vsyncpa [#allocation12], 1 }
 0x546   :  { %1165 = vsyncpa [#allocation4], 1 }

</bundles_post_ra>
